<compile_context>
chip_gen: v7x
topology: tpu7x:2x2x1
jax: 0.10.0
libtpu: 0.0.40
codegen_flags: <defaults>
</compile_context>

<pallas_src>
from functools import partial

import numpy as np
import jax
import jax.numpy as jnp
from jax import lax
from jax.experimental import pallas as pl
from jax.experimental.pallas import tpu as pltpu

# ----------------------------- config (cfg.*) ------------------------------
COST_CLASS = 1.0
COST_BBOX = 1.0
COST_GIOU = 1.0
USE_FOCAL = False      # TODO(synk): only the softmax class-cost branch is
USE_FED_LOSS = False   # implemented (cfg defaults); focal / fed-loss paths not ported.
OTA_K = 5
CENTER_RADIUS = 2.5

# packed GT metadata columns: 0-6 gt box, 7 label, 8-10 offset_size_xyxy_tgt,
# 11-13 image_size_xyxy_tgt, 14-16 grid_size_tgt, 17-23 unused padding.
META_W = 24
Q_TILE = 512           # query tile (lane axis); bounds VMEM on v7x / v5e.


# ------------------------------ Pallas kernel ------------------------------
def make_cost_kernel(G, C, gx, gy, gz, w_class, w_bbox, w_giou, center_radius):
    """G, C are the padded tile sizes; gx/gy/gz are the static grid_size_xyz.
    No array constants are closed over (only Python scalars), so nothing is
    captured by the kernel trace."""
    f32 = jnp.float32
    inv_gx = 1.0 / gx
    inv_gy = 1.0 / gy
    inv_gz = 1.0 / gz

    def wmul(w, x):          # trace-time: skip the multiply when weight == 1
        return x if w == 1.0 else w * x

    def kernel(ng_ref, logits_ref, boxes_ref, meta_ref, cost_ref, iou_ref):
        b = pl.program_id(0)
        ng = ng_ref[b]                       # actual num GT for this element

        logits = logits_ref[...]             # (Cpad, TQ), padded logits = -1e9
        boxes = boxes_ref[...]               # (8, TQ), rows 0-6 = pred box dims
        meta = meta_ref[...]                 # (Gpad, META_W)

        # ---- class cost: softmax over classes + one-hot gather on the MXU ----
        m = jnp.max(logits, axis=0, keepdims=True)                 # (1, TQ)
        e = jnp.exp(logits - m)                                     # (Cpad, TQ)
        inv_sum = pl.reciprocal(jnp.sum(e, axis=0, keepdims=True),
                                approx=True)                        # (1, TQ) EUP
        labels = meta[:, 7:8].astype(jnp.int32)                     # (G, 1)
        onehot = (labels == lax.broadcasted_iota(jnp.int32, (G, C), 1)).astype(f32)
        cost_class = -jnp.dot(onehot, e, preferred_element_type=f32) * inv_sum

        # ---- grid-normalized pred boxes (out_bbox_), per-row scalar scaling ----
        onx = boxes[0:1, :] * inv_gx
        ony = boxes[1:2, :] * inv_gy
        onz = boxes[2:3, :] * inv_gz
        ondx = boxes[3:4, :] * inv_gx
        ondy = boxes[4:5, :] * inv_gy
        ondz = boxes[5:6, :] * inv_gz
        onang = boxes[6:7, :]

        # ---- world-space pred centers (image_size_xyxy_tgt[0] = meta row 0) ----
        px = onx * meta[0:1, 11:12]
        py = ony * meta[0:1, 12:13]
        pz = onz * meta[0:1, 13:14]

        # ---- normalized GT boxes (tgt_bbox_) and BEV-grid targets ----
        inv_img = 1.0 / meta[:, 11:14]                              # (G, 3)
        tgt_xyz = (meta[:, 0:3] - meta[:, 8:11]) * inv_img
        tgt_dim = meta[:, 3:6] * inv_img
        tgt_ang = meta[:, 6:7]
        grt = meta[:, 14:17]
        bev_xyz = tgt_xyz * grt
        bev_dim = tgt_dim * grt

        # ---- L1 cdist(out_bbox_, tgt_bbox_) over the 7 box dims ----
        cost_bbox = (jnp.abs(onx - tgt_xyz[:, 0:1])
                     + jnp.abs(ony - tgt_xyz[:, 1:2])
                     + jnp.abs(onz - tgt_xyz[:, 2:3])
                     + jnp.abs(ondx - tgt_dim[:, 0:1])
                     + jnp.abs(ondy - tgt_dim[:, 1:2])
                     + jnp.abs(ondz - tgt_dim[:, 2:3])
                     + jnp.abs(onang - tgt_ang))

        # ---- pairwise 3D IoU (pred grid boxes vs tgt_bbox_bev) ----
        # TODO(synk): iou3d_nms_utils.boxes_iou3d_gpu does rotated-BEV polygon
        # intersection (external CUDA op); approximated axis-aligned here.
        def overlap(pc, pd, tc, td):
            lo = jnp.maximum(pc - 0.5 * pd, tc - 0.5 * td)
            hi = jnp.minimum(pc + 0.5 * pd, tc + 0.5 * td)
            return jnp.maximum(hi - lo, 0.0)

        ovx = overlap(boxes[0:1, :], boxes[3:4, :], bev_xyz[:, 0:1], bev_dim[:, 0:1])
        ovy = overlap(boxes[1:2, :], boxes[4:5, :], bev_xyz[:, 1:2], bev_dim[:, 1:2])
        ovz = overlap(boxes[2:3, :], boxes[5:6, :], bev_xyz[:, 2:3], bev_dim[:, 2:3])
        inter = ovx * ovy * ovz
        vol_p = boxes[3:4, :] * boxes[4:5, :] * boxes[5:6, :]        # (1, TQ)
        vol_t = bev_dim[:, 0:1] * bev_dim[:, 1:2] * bev_dim[:, 2:3]  # (G, 1)
        # exact divide kept: dynamic_ks = floor(sum top-k IoU) is sensitive
        # near integer boundaries.
        iou = inter / jnp.maximum(vol_p + vol_t - inter, 1e-6)

        # ---- get_in_boxes_info: shared rotated-frame projection ----
        # The 0<=AB.AP<=|AB|^2 / 0<=AD.AP<=|AD|^2 quad test is equivalent to
        # |u|<=dx/2, |v|<=dy/2 with (u,v) the point expressed in the box frame.
        gcx, gcy, gcz = meta[:, 0:1], meta[:, 1:2], meta[:, 2:3]
        hgx = 0.5 * meta[:, 3:4]
        hgy = 0.5 * meta[:, 4:5]
        hgz = 0.5 * meta[:, 5:6]
        ca = jnp.cos(meta[:, 6:7])
        sa = jnp.sin(meta[:, 6:7])

        dx = px - gcx                           # (G, TQ)
        dy = py - gcy
        u = ca * dx - sa * dy
        v = sa * dx + ca * dy
        au = jnp.abs(u)
        av = jnp.abs(v)
        adz = jnp.abs(pz - gcz)

        in_boxes = (au <= hgx) & (av <= hgy) & (adz < hgz)
        cr = center_radius
        # NOTE: reproduces the reference's in-place mutation: dims are scaled
        # by center_radius before the center test, and the z-extent is scaled
        # by center_radius AGAIN for the z-bound (cr * (cr * gdz)).
        in_centers = ((au <= cr * hgx) & (av <= cr * hgy)
                      & (adz < (cr * cr) * hgz))

        gt_valid = lax.broadcasted_iota(jnp.int32, (G, 1), 0) < ng   # (G, 1)
        in_boxes = in_boxes & gt_valid
        in_centers = in_centers & gt_valid

        in_any = in_boxes | in_centers
        fg = jnp.max(jnp.where(in_any, 1.0, 0.0), axis=0, keepdims=True) > 0.0
        ibc = in_boxes & in_centers                                  # (G, TQ)

        cost = (wmul(w_bbox, cost_bbox) + wmul(w_class, cost_class)
                - wmul(w_giou, iou)
                + jnp.where(ibc, 0.0, 100.0)
                + jnp.where(fg, 0.0, 10000.0))

        cost_ref[...] = jnp.where(gt_valid, cost, 1e8)   # mask padded GT rows
        iou_ref[...] = jnp.where(gt_valid, iou, 0.0)

    return kernel


def cost_matrix_pallas(num_gt, logits_t, boxes_t, meta, grid_size_xyz, tq):
    """One batched pallas_call over grid=(B, Q_pad//tq).  Returns (cost, iou)
    of shape (B, G_pad, Q_pad)."""
    B, C_pad, Q_pad = logits_t.shape
    G_pad = meta.shape[1]
    n_q = Q_pad // tq
    kernel = make_cost_kernel(G_pad, C_pad,
                              float(grid_size_xyz[0]), float(grid_size_xyz[1]),
                              float(grid_size_xyz[2]),
                              COST_CLASS, COST_BBOX, COST_GIOU, CENTER_RADIUS)
    grid_spec = pltpu.PrefetchScalarGridSpec(
        num_scalar_prefetch=1,                       # num_gt -> SMEM
        grid=(B, n_q),
        in_specs=[
            pl.BlockSpec((None, C_pad, tq), lambda b, q, ng: (b, 0, q)),
            pl.BlockSpec((None, 8, tq), lambda b, q, ng: (b, 0, q)),
            # meta block index depends only on b -> DMA'd once per batch elem.
            pl.BlockSpec((None, G_pad, META_W), lambda b, q, ng: (b, 0, 0)),
        ],
        out_specs=(
            pl.BlockSpec((None, G_pad, tq), lambda b, q, ng: (b, 0, q)),
            pl.BlockSpec((None, G_pad, tq), lambda b, q, ng: (b, 0, q)),
        ),
    )
    return pl.pallas_call(
        kernel,
        out_shape=(jax.ShapeDtypeStruct((B, G_pad, Q_pad), jnp.float32),
                   jax.ShapeDtypeStruct((B, G_pad, Q_pad), jnp.float32)),
        grid_spec=grid_spec,
        compiler_params=pltpu.CompilerParams(
            dimension_semantics=("parallel", "parallel"),
            # safe on v5e (16 MiB scoped default), v6e and v7x (64 MiB phys).
            vmem_limit_bytes=32 * 1024 * 1024),
    )(num_gt, logits_t, boxes_t, meta)


# ---------------------- device pipeline (jit, one sync) ---------------------
@partial(jax.jit, static_argnames=("grid_size_xyz", "g_max"))
def _matcher_device(num_gts, pred_logits, pred_boxes, meta, *, grid_size_xyz,
                    g_max):
    B, Q, C = pred_logits.shape
    if Q <= Q_TILE:
        Q_pad = ((Q + 127) // 128) * 128
        tq = Q_pad
    else:
        tq = Q_TILE
        Q_pad = ((Q + tq - 1) // tq) * tq
    C_pad = ((C + 7) // 8) * 8

    # lane-dense padding done on device (no host NumPy transposes):
    # queries -> multiple of tq, classes -> multiple of 8, padded logits -1e9.
    logits_t = jnp.pad(jnp.transpose(pred_logits, (0, 2, 1)),
                       ((0, 0), (0, C_pad - C), (0, Q_pad - Q)),
                       constant_values=-1e9)
    boxes_t = jnp.pad(jnp.transpose(pred_boxes, (0, 2, 1)),
                      ((0, 0), (0, 8 - pred_boxes.shape[2]), (0, Q_pad - Q)))

    cost, iou = cost_matrix_pallas(num_gts, logits_t, boxes_t, meta,
                                   grid_size_xyz, tq)

    # dynamic_ks reduced on device: only (B, G_max) ints cross D2H for the IoU.
    topk, _ = lax.top_k(iou, min(OTA_K, Q_pad))
    dynamic_ks = jnp.maximum(jnp.sum(topk, axis=-1).astype(jnp.int32), 1)

    return cost[:, :g_max, :Q], dynamic_ks[:, :g_max]


# ------------------- simOTA dynamic-k assignment (host glue) ---------------
def dynamic_k_matching_np(cost, dynamic_ks, num_gt):
    cost = np.array(cost, dtype=np.float64)
    Q, G = cost.shape
    matching = np.zeros_like(cost)
    for g in range(num_gt):
        kg = min(int(dynamic_ks[g]), Q)
        pos = np.argsort(cost[:, g], kind="stable")[:kg]        # smallest cost
        matching[pos, g] = 1.0
    anchor_matching_gt = matching.sum(1)
    if (anchor_matching_gt > 1).sum() > 0:
        rows = anchor_matching_gt > 1
        cost_argmin = np.argmin(cost[rows], axis=1)
        matching[rows] = 0.0
        matching[np.nonzero(rows)[0], cost_argmin] = 1.0
    while (matching.sum(0) == 0).any():
        matched_query_id = matching.sum(1) > 0
        cost[matched_query_id] += 100000.0
        unmatch = np.nonzero(matching.sum(0) == 0)[0]
        for g in unmatch:
            pos = np.argmin(cost[:, g])
            matching[pos, g] = 1.0
        if (matching.sum(1) > 1).sum() > 0:
            anchor_matching_gt = matching.sum(1)
            rows = anchor_matching_gt > 1
            cost_argmin = np.argmin(cost[rows], axis=1)
            matching[rows] = 0.0
            matching[np.nonzero(rows)[0], cost_argmin] = 1.0
    assert not (matching.sum(0) == 0).any()
    selected = matching.sum(1) > 0
    gt_indices = matching[selected].argmax(1)
    sel_idx = np.nonzero(selected)[0]
    return (sel_idx, gt_indices), len(gt_indices)


# ------------------------------ matcher forward -----------------------------
def hungarian_matcher_forward(pred_logits, pred_boxes, targets):
    pred_logits = jnp.asarray(pred_logits, jnp.float32)
    pred_boxes = jnp.asarray(pred_boxes, jnp.float32)
    B, Q, C = pred_logits.shape
    grid_size_xyz = tuple(float(v) for v in np.asarray(targets[0]["grid_size_xyz"]))

    num_gts = np.array([int(np.asarray(t["labels"]).shape[0]) for t in targets],
                       np.int32)
    G_max = int(num_gts.max()) if B > 0 else 0
    if G_max == 0:
        return [], 0

    G_pad = ((G_max + 7) // 8) * 8
    meta = np.zeros((B, G_pad, META_W), np.float32)
    meta[:, :, 11:17] = 1.0      # nonzero img/grid sizes for padded GT rows
    for b, tgt in enumerate(targets):
        g = int(num_gts[b])
        if g == 0:
            continue
        meta[b, :g, 0:7] = np.asarray(tgt["gt_boxes"], np.float32)
        meta[b, :g, 7] = np.asarray(tgt["labels"], np.float32)
        meta[b, :g, 8:11] = np.asarray(tgt["offset_size_xyxy_tgt"], np.float32)
        meta[b, :g, 11:14] = np.asarray(tgt["image_size_xyxy_tgt"], np.float32)
        meta[b, :g, 14:17] = np.asarray(tgt["grid_size_tgt"], np.float32)

    cost_d, ks_d = _matcher_device(
        jnp.asarray(num_gts), pred_logits, pred_boxes, jnp.asarray(meta),
        grid_size_xyz=grid_size_xyz, g_max=G_max)
    # single device -> host sync for the whole batch; only the used
    # (B, G_max, Q) cost slab and (B, G_max) dynamic-k ints are transferred.
    cost_all = np.asarray(jax.block_until_ready(cost_d))
    ks_all = np.asarray(ks_d)

    matched_results = []
    num_matched_gt = 0
    for b in range(B):
        g = int(num_gts[b])
        if g == 0:
            # matches the reference: empty targets contribute nothing to
            # matched_results / num_matched_gt.
            continue
        cost_b = cost_all[b, :g, :].T       # (Q, G)
        ks_b = ks_all[b, :g]
        matched_result, n = dynamic_k_matching_np(cost_b, ks_b, g)
        matched_results.append(matched_result)
        num_matched_gt += n
    return matched_results, num_matched_gt


# ----------------------------------- main -----------------------------------
if __name__ == "__main__":
    key = jax.random.PRNGKey(0)
    B, Q, C, G = 2, 64, 4, 8
    GRID = jnp.array([128.0, 128.0, 8.0], jnp.float32)   # grid_size_xyz
    IMG = jnp.array([100.0, 100.0, 8.0], jnp.float32)    # world extents

    keys = jax.random.split(key, 8)
    pred_logits = jax.random.normal(keys[0], (B, Q, C), jnp.float32)
    centers = jax.random.uniform(keys[1], (B, Q, 3), jnp.float32) * GRID
    dims = jax.random.uniform(keys[2], (B, Q, 3), jnp.float32) * 6.0 + 1.0
    ang = jax.random.uniform(keys[3], (B, Q, 1), jnp.float32) * 2 * jnp.pi - jnp.pi
    pred_boxes = jnp.concatenate([centers, dims, ang], axis=-1)   # (B, Q, 7)

    targets = []
    for b in range(B):
        kb = jax.random.fold_in(keys[4], b)
        k1, k2, k3, k4 = jax.random.split(kb, 4)
        gtc = jax.random.uniform(k1, (G, 3), jnp.float32) * IMG
        gtd = jax.random.uniform(k2, (G, 3), jnp.float32) * 5.0 + 1.0
        gta = jax.random.uniform(k3, (G, 1), jnp.float32) * 2 * jnp.pi - jnp.pi
        gt_boxes = jnp.concatenate([gtc, gtd, gta], axis=-1)      # (G, 7)
        labels = jax.random.randint(k4, (G,), 0, C)
        targets.append(dict(
            labels=labels,
            gt_boxes=gt_boxes,
            offset_size_xyxy_tgt=jnp.zeros((G, 3), jnp.float32),
            image_size_xyxy_tgt=jnp.tile(IMG[None, :], (G, 1)),
            grid_size_tgt=jnp.tile(GRID[None, :], (G, 1)),
            grid_size_xyz=GRID,
        ))

    matched_results, num_matched_gt = hungarian_matcher_forward(
        pred_logits, pred_boxes, targets)

    assert len(matched_results) == B
    assert num_matched_gt >= B * 1
    for (sel_q, gt_idx) in matched_results:
        assert len(sel_q) == len(gt_idx)
    print("KERNEL_OK")
</pallas_src>

<mosaic_0001>
module attributes {stable_mosaic.version = 11 : i64} {
  func.func @kernel(%arg0: i32, %arg1: i32, %arg2: memref<2xi32, #tpu.memory_space<smem>>, %arg3: memref<1x8x128xf32, #tpu.memory_space<vmem>>, %arg4: memref<1x8x128xf32, #tpu.memory_space<vmem>>, %arg5: memref<1x8x24xf32, #tpu.memory_space<vmem>>, %arg6: memref<1x8x128xf32, #tpu.memory_space<vmem>>, %arg7: memref<1x8x128xf32, #tpu.memory_space<vmem>>) attributes {dimension_semantics = [#tpu.dimension_semantics<parallel>, #tpu.dimension_semantics<parallel>], iteration_bounds = array<i64: 2, 1>, scalar_prefetch = 1 : i64, scratch_operands = 0 : i64, tpu.core_type = #tpu.core_type<tc>, window_params = [{transform_indices = @transform_0, window_bounds = array<i64: 1, 8, 128>}, {transform_indices = @transform_1, window_bounds = array<i64: 1, 8, 128>}, {transform_indices = @transform_2, window_bounds = array<i64: 1, 8, 24>}, {transform_indices = @transform_3, window_bounds = array<i64: 1, 8, 128>}, {transform_indices = @transform_4, window_bounds = array<i64: 1, 8, 128>}]} {
    %0 = arith.index_cast %arg0 : i32 to index
    %1 = memref.load %arg2[%0] : memref<2xi32, #tpu.memory_space<smem>>
    %c0 = arith.constant 0 : index
    %c0_0 = arith.constant 0 : index
    %c0_1 = arith.constant 0 : index
    %2 = vector.load %arg3[%c0, %c0_0, %c0_1] : memref<1x8x128xf32, #tpu.memory_space<vmem>>, vector<1x8x128xf32>
    %3 = vector.shape_cast %2 : vector<1x8x128xf32> to vector<8x128xf32>
    %c0_2 = arith.constant 0 : index
    %c0_3 = arith.constant 0 : index
    %c0_4 = arith.constant 0 : index
    %4 = vector.load %arg4[%c0_2, %c0_3, %c0_4] : memref<1x8x128xf32, #tpu.memory_space<vmem>>, vector<1x8x128xf32>
    %5 = vector.shape_cast %4 : vector<1x8x128xf32> to vector<8x128xf32>
    %c0_5 = arith.constant 0 : index
    %c0_6 = arith.constant 0 : index
    %c0_7 = arith.constant 0 : index
    %6 = vector.load %arg5[%c0_5, %c0_6, %c0_7] : memref<1x8x24xf32, #tpu.memory_space<vmem>>, vector<1x8x24xf32>
    %7 = vector.shape_cast %6 : vector<1x8x24xf32> to vector<8x24xf32>
    %cst = arith.constant dense<0xFF800000> : vector<128xf32>
    %8 = vector.multi_reduction <maximumf>, %3, %cst [0] : vector<8x128xf32> to vector<128xf32>
    %9 = vector.shape_cast %8 : vector<128xf32> to vector<1x128xf32>
    %10 = vector.broadcast %9 : vector<1x128xf32> to vector<8x128xf32>
    %11 = arith.subf %3, %10 : vector<8x128xf32>
    %12 = math.exp %11 : vector<8x128xf32>
    %cst_8 = arith.constant dense<0.000000e+00> : vector<128xf32>
    %13 = vector.multi_reduction <add>, %12, %cst_8 [0] : vector<8x128xf32> to vector<128xf32>
    %14 = vector.shape_cast %13 : vector<128xf32> to vector<1x128xf32>
    %15 = tpu.reciprocal %14 {approx = true} : vector<1x128xf32> -> vector<1x128xf32>
    %16 = vector.extract_strided_slice %7 {offsets = [0, 7], sizes = [8, 1], strides = [1, 1]} : vector<8x24xf32> to vector<8x1xf32>
    %17 = arith.fptosi %16 : vector<8x1xf32> to vector<8x1xi32>
    %18 = tpu.iota {dimensions = array<i32: 1>} : vector<8x8xi32>
    %19 = vector.broadcast %17 : vector<8x1xi32> to vector<8x8xi32>
    %20 = arith.cmpi eq, %19, %18 : vector<8x8xi32>
    %21 = arith.extui %20 : vector<8x8xi1> to vector<8x8xi32>
    %22 = arith.sitofp %21 : vector<8x8xi32> to vector<8x8xf32>
    %cst_9 = arith.constant dense<0.000000e+00> : vector<8x128xf32>
    %23 = tpu.matmul %22, %12, %cst_9 {dimension_numbers = #tpu.dot_dimension_numbers<[1], [0], [0], [1], [0, 0, 1, 1], [], []>} : vector<8x8xf32>, vector<8x128xf32>, vector<8x128xf32> -> vector<8x128xf32>
    %cst_10 = arith.constant 0.000000e+00 : f32
    %24 = vector.broadcast %cst_10 : f32 to vector<8x128xf32>
    %25 = arith.subf %24, %23 : vector<8x128xf32>
    %26 = vector.broadcast %15 : vector<1x128xf32> to vector<8x128xf32>
    %27 = arith.mulf %25, %26 : vector<8x128xf32>
    %28 = vector.extract_strided_slice %5 {offsets = [0, 0], sizes = [1, 128], strides = [1, 1]} : vector<8x128xf32> to vector<1x128xf32>
    %cst_11 = arith.constant 7.812500e-03 : f32
    %29 = vector.broadcast %cst_11 : f32 to vector<1x128xf32>
    %30 = arith.mulf %28, %29 : vector<1x128xf32>
    %31 = vector.extract_strided_slice %5 {offsets = [1, 0], sizes = [1, 128], strides = [1, 1]} : vector<8x128xf32> to vector<1x128xf32>
    %cst_12 = arith.constant 7.812500e-03 : f32
    %32 = vector.broadcast %cst_12 : f32 to vector<1x128xf32>
    %33 = arith.mulf %31, %32 : vector<1x128xf32>
    %34 = vector.extract_strided_slice %5 {offsets = [2, 0], sizes = [1, 128], strides = [1, 1]} : vector<8x128xf32> to vector<1x128xf32>
    %cst_13 = arith.constant 1.250000e-01 : f32
    %35 = vector.broadcast %cst_13 : f32 to vector<1x128xf32>
    %36 = arith.mulf %34, %35 : vector<1x128xf32>
    %37 = vector.extract_strided_slice %5 {offsets = [3, 0], sizes = [1, 128], strides = [1, 1]} : vector<8x128xf32> to vector<1x128xf32>
    %cst_14 = arith.constant 7.812500e-03 : f32
    %38 = vector.broadcast %cst_14 : f32 to vector<1x128xf32>
    %39 = arith.mulf %37, %38 : vector<1x128xf32>
    %40 = vector.extract_strided_slice %5 {offsets = [4, 0], sizes = [1, 128], strides = [1, 1]} : vector<8x128xf32> to vector<1x128xf32>
    %cst_15 = arith.constant 7.812500e-03 : f32
    %41 = vector.broadcast %cst_15 : f32 to vector<1x128xf32>
    %42 = arith.mulf %40, %41 : vector<1x128xf32>
    %43 = vector.extract_strided_slice %5 {offsets = [5, 0], sizes = [1, 128], strides = [1, 1]} : vector<8x128xf32> to vector<1x128xf32>
    %cst_16 = arith.constant 1.250000e-01 : f32
    %44 = vector.broadcast %cst_16 : f32 to vector<1x128xf32>
    %45 = arith.mulf %43, %44 : vector<1x128xf32>
    %46 = vector.extract_strided_slice %5 {offsets = [6, 0], sizes = [1, 128], strides = [1, 1]} : vector<8x128xf32> to vector<1x128xf32>
    %47 = vector.extract_strided_slice %7 {offsets = [0, 11], sizes = [1, 1], strides = [1, 1]} : vector<8x24xf32> to vector<1x1xf32>
    %48 = vector.broadcast %47 : vector<1x1xf32> to vector<1x128xf32>
    %49 = arith.mulf %30, %48 : vector<1x128xf32>
    %50 = vector.extract_strided_slice %7 {offsets = [0, 12], sizes = [1, 1], strides = [1, 1]} : vector<8x24xf32> to vector<1x1xf32>
    %51 = vector.broadcast %50 : vector<1x1xf32> to vector<1x128xf32>
    %52 = arith.mulf %33, %51 : vector<1x128xf32>
    %53 = vector.extract_strided_slice %7 {offsets = [0, 13], sizes = [1, 1], strides = [1, 1]} : vector<8x24xf32> to vector<1x1xf32>
    %54 = vector.broadcast %53 : vector<1x1xf32> to vector<1x128xf32>
    %55 = arith.mulf %36, %54 : vector<1x128xf32>
    %56 = vector.extract_strided_slice %7 {offsets = [0, 11], sizes = [8, 3], strides = [1, 1]} : vector<8x24xf32> to vector<8x3xf32>
    %cst_17 = arith.constant 1.000000e+00 : f32
    %57 = vector.broadcast %cst_17 : f32 to vector<8x3xf32>
    %58 = arith.divf %57, %56 : vector<8x3xf32>
    %59 = vector.extract_strided_slice %7 {offsets = [0, 0], sizes = [8, 3], strides = [1, 1]} : vector<8x24xf32> to vector<8x3xf32>
    %60 = vector.extract_strided_slice %7 {offsets = [0, 8], sizes = [8, 3], strides = [1, 1]} : vector<8x24xf32> to vector<8x3xf32>
    %61 = arith.subf %59, %60 : vector<8x3xf32>
    %62 = arith.mulf %61, %58 : vector<8x3xf32>
    %63 = vector.extract_strided_slice %7 {offsets = [0, 3], sizes = [8, 3], strides = [1, 1]} : vector<8x24xf32> to vector<8x3xf32>
    %64 = arith.mulf %63, %58 : vector<8x3xf32>
    %65 = vector.extract_strided_slice %7 {offsets = [0, 6], sizes = [8, 1], strides = [1, 1]} : vector<8x24xf32> to vector<8x1xf32>
    %66 = vector.extract_strided_slice %7 {offsets = [0, 14], sizes = [8, 3], strides = [1, 1]} : vector<8x24xf32> to vector<8x3xf32>
    %67 = arith.mulf %62, %66 : vector<8x3xf32>
    %68 = arith.mulf %64, %66 : vector<8x3xf32>
    %69 = vector.extract_strided_slice %62 {offsets = [0, 0], sizes = [8, 1], strides = [1, 1]} : vector<8x3xf32> to vector<8x1xf32>
    %70 = vector.broadcast %30 : vector<1x128xf32> to vector<8x128xf32>
    %71 = vector.broadcast %69 : vector<8x1xf32> to vector<8x128xf32>
    %72 = arith.subf %70, %71 : vector<8x128xf32>
    %73 = math.absf %72 : vector<8x128xf32>
    %74 = vector.extract_strided_slice %62 {offsets = [0, 1], sizes = [8, 1], strides = [1, 1]} : vector<8x3xf32> to vector<8x1xf32>
    %75 = vector.broadcast %33 : vector<1x128xf32> to vector<8x128xf32>
    %76 = vector.broadcast %74 : vector<8x1xf32> to vector<8x128xf32>
    %77 = arith.subf %75, %76 : vector<8x128xf32>
    %78 = math.absf %77 : vector<8x128xf32>
    %79 = arith.addf %73, %78 : vector<8x128xf32>
    %80 = vector.extract_strided_slice %62 {offsets = [0, 2], sizes = [8, 1], strides = [1, 1]} : vector<8x3xf32> to vector<8x1xf32>
    %81 = vector.broadcast %36 : vector<1x128xf32> to vector<8x128xf32>
    %82 = vector.broadcast %80 : vector<8x1xf32> to vector<8x128xf32>
    %83 = arith.subf %81, %82 : vector<8x128xf32>
    %84 = math.absf %83 : vector<8x128xf32>
    %85 = arith.addf %79, %84 : vector<8x128xf32>
    %86 = vector.extract_strided_slice %64 {offsets = [0, 0], sizes = [8, 1], strides = [1, 1]} : vector<8x3xf32> to vector<8x1xf32>
    %87 = vector.broadcast %39 : vector<1x128xf32> to vector<8x128xf32>
    %88 = vector.broadcast %86 : vector<8x1xf32> to vector<8x128xf32>
    %89 = arith.subf %87, %88 : vector<8x128xf32>
    %90 = math.absf %89 : vector<8x128xf32>
    %91 = arith.addf %85, %90 : vector<8x128xf32>
    %92 = vector.extract_strided_slice %64 {offsets = [0, 1], sizes = [8, 1], strides = [1, 1]} : vector<8x3xf32> to vector<8x1xf32>
    %93 = vector.broadcast %42 : vector<1x128xf32> to vector<8x128xf32>
    %94 = vector.broadcast %92 : vector<8x1xf32> to vector<8x128xf32>
    %95 = arith.subf %93, %94 : vector<8x128xf32>
    %96 = math.absf %95 : vector<8x128xf32>
    %97 = arith.addf %91, %96 : vector<8x128xf32>
    %98 = vector.extract_strided_slice %64 {offsets = [0, 2], sizes = [8, 1], strides = [1, 1]} : vector<8x3xf32> to vector<8x1xf32>
    %99 = vector.broadcast %45 : vector<1x128xf32> to vector<8x128xf32>
    %100 = vector.broadcast %98 : vector<8x1xf32> to vector<8x128xf32>
    %101 = arith.subf %99, %100 : vector<8x128xf32>
    %102 = math.absf %101 : vector<8x128xf32>
    %103 = arith.addf %97, %102 : vector<8x128xf32>
    %104 = vector.broadcast %46 : vector<1x128xf32> to vector<8x128xf32>
    %105 = vector.broadcast %65 : vector<8x1xf32> to vector<8x128xf32>
    %106 = arith.subf %104, %105 : vector<8x128xf32>
    %107 = math.absf %106 : vector<8x128xf32>
    %108 = arith.addf %103, %107 : vector<8x128xf32>
    %109 = vector.extract_strided_slice %5 {offsets = [0, 0], sizes = [1, 128], strides = [1, 1]} : vector<8x128xf32> to vector<1x128xf32>
    %110 = vector.extract_strided_slice %5 {offsets = [3, 0], sizes = [1, 128], strides = [1, 1]} : vector<8x128xf32> to vector<1x128xf32>
    %111 = vector.extract_strided_slice %67 {offsets = [0, 0], sizes = [8, 1], strides = [1, 1]} : vector<8x3xf32> to vector<8x1xf32>
    %112 = vector.extract_strided_slice %68 {offsets = [0, 0], sizes = [8, 1], strides = [1, 1]} : vector<8x3xf32> to vector<8x1xf32>
    %cst_18 = arith.constant 5.000000e-01 : f32
    %113 = vector.broadcast %cst_18 : f32 to vector<1x128xf32>
    %114 = arith.mulf %113, %110 : vector<1x128xf32>
    %115 = arith.subf %109, %114 : vector<1x128xf32>
    %cst_19 = arith.constant 5.000000e-01 : f32
    %116 = vector.broadcast %cst_19 : f32 to vector<8x1xf32>
    %117 = arith.mulf %116, %112 : vector<8x1xf32>
    %118 = arith.subf %111, %117 : vector<8x1xf32>
    %119 = vector.broadcast %115 : vector<1x128xf32> to vector<8x128xf32>
    %120 = vector.broadcast %118 : vector<8x1xf32> to vector<8x128xf32>
    %121 = arith.maximumf %119, %120 : vector<8x128xf32>
    %cst_20 = arith.constant 5.000000e-01 : f32
    %122 = vector.broadcast %cst_20 : f32 to vector<1x128xf32>
    %123 = arith.mulf %122, %110 : vector<1x128xf32>
    %124 = arith.addf %109, %123 : vector<1x128xf32>
    %cst_21 = arith.constant 5.000000e-01 : f32
    %125 = vector.broadcast %cst_21 : f32 to vector<8x1xf32>
    %126 = arith.mulf %125, %112 : vector<8x1xf32>
    %127 = arith.addf %111, %126 : vector<8x1xf32>
    %128 = vector.broadcast %124 : vector<1x128xf32> to vector<8x128xf32>
    %129 = vector.broadcast %127 : vector<8x1xf32> to vector<8x128xf32>
    %130 = arith.minimumf %128, %129 : vector<8x128xf32>
    %131 = arith.subf %130, %121 : vector<8x128xf32>
    %cst_22 = arith.constant 0.000000e+00 : f32
    %132 = vector.broadcast %cst_22 : f32 to vector<8x128xf32>
    %133 = arith.maximumf %131, %132 : vector<8x128xf32>
    %134 = vector.extract_strided_slice %5 {offsets = [1, 0], sizes = [1, 128], strides = [1, 1]} : vector<8x128xf32> to vector<1x128xf32>
    %135 = vector.extract_strided_slice %5 {offsets = [4, 0], sizes = [1, 128], strides = [1, 1]} : vector<8x128xf32> to vector<1x128xf32>
    %136 = vector.extract_strided_slice %67 {offsets = [0, 1], sizes = [8, 1], strides = [1, 1]} : vector<8x3xf32> to vector<8x1xf32>
    %137 = vector.extract_strided_slice %68 {offsets = [0, 1], sizes = [8, 1], strides = [1, 1]} : vector<8x3xf32> to vector<8x1xf32>
    %cst_23 = arith.constant 5.000000e-01 : f32
    %138 = vector.broadcast %cst_23 : f32 to vector<1x128xf32>
    %139 = arith.mulf %138, %135 : vector<1x128xf32>
    %140 = arith.subf %134, %139 : vector<1x128xf32>
    %cst_24 = arith.constant 5.000000e-01 : f32
    %141 = vector.broadcast %cst_24 : f32 to vector<8x1xf32>
    %142 = arith.mulf %141, %137 : vector<8x1xf32>
    %143 = arith.subf %136, %142 : vector<8x1xf32>
    %144 = vector.broadcast %140 : vector<1x128xf32> to vector<8x128xf32>
    %145 = vector.broadcast %143 : vector<8x1xf32> to vector<8x128xf32>
    %146 = arith.maximumf %144, %145 : vector<8x128xf32>
    %cst_25 = arith.constant 5.000000e-01 : f32
    %147 = vector.broadcast %cst_25 : f32 to vector<1x128xf32>
    %148 = arith.mulf %147, %135 : vector<1x128xf32>
    %149 = arith.addf %134, %148 : vector<1x128xf32>
    %cst_26 = arith.constant 5.000000e-01 : f32
    %150 = vector.broadcast %cst_26 : f32 to vector<8x1xf32>
    %151 = arith.mulf %150, %137 : vector<8x1xf32>
    %152 = arith.addf %136, %151 : vector<8x1xf32>
    %153 = vector.broadcast %149 : vector<1x128xf32> to vector<8x128xf32>
    %154 = vector.broadcast %152 : vector<8x1xf32> to vector<8x128xf32>
    %155 = arith.minimumf %153, %154 : vector<8x128xf32>
    %156 = arith.subf %155, %146 : vector<8x128xf32>
    %cst_27 = arith.constant 0.000000e+00 : f32
    %157 = vector.broadcast %cst_27 : f32 to vector<8x128xf32>
    %158 = arith.maximumf %156, %157 : vector<8x128xf32>
    %159 = vector.extract_strided_slice %5 {offsets = [2, 0], sizes = [1, 128], strides = [1, 1]} : vector<8x128xf32> to vector<1x128xf32>
    %160 = vector.extract_strided_slice %5 {offsets = [5, 0], sizes = [1, 128], strides = [1, 1]} : vector<8x128xf32> to vector<1x128xf32>
    %161 = vector.extract_strided_slice %67 {offsets = [0, 2], sizes = [8, 1], strides = [1, 1]} : vector<8x3xf32> to vector<8x1xf32>
    %162 = vector.extract_strided_slice %68 {offsets = [0, 2], sizes = [8, 1], strides = [1, 1]} : vector<8x3xf32> to vector<8x1xf32>
    %cst_28 = arith.constant 5.000000e-01 : f32
    %163 = vector.broadcast %cst_28 : f32 to vector<1x128xf32>
    %164 = arith.mulf %163, %160 : vector<1x128xf32>
    %165 = arith.subf %159, %164 : vector<1x128xf32>
    %cst_29 = arith.constant 5.000000e-01 : f32
    %166 = vector.broadcast %cst_29 : f32 to vector<8x1xf32>
    %167 = arith.mulf %166, %162 : vector<8x1xf32>
    %168 = arith.subf %161, %167 : vector<8x1xf32>
    %169 = vector.broadcast %165 : vector<1x128xf32> to vector<8x128xf32>
    %170 = vector.broadcast %168 : vector<8x1xf32> to vector<8x128xf32>
    %171 = arith.maximumf %169, %170 : vector<8x128xf32>
    %cst_30 = arith.constant 5.000000e-01 : f32
    %172 = vector.broadcast %cst_30 : f32 to vector<1x128xf32>
    %173 = arith.mulf %172, %160 : vector<1x128xf32>
    %174 = arith.addf %159, %173 : vector<1x128xf32>
    %cst_31 = arith.constant 5.000000e-01 : f32
    %175 = vector.broadcast %cst_31 : f32 to vector<8x1xf32>
    %176 = arith.mulf %175, %162 : vector<8x1xf32>
    %177 = arith.addf %161, %176 : vector<8x1xf32>
    %178 = vector.broadcast %174 : vector<1x128xf32> to vector<8x128xf32>
    %179 = vector.broadcast %177 : vector<8x1xf32> to vector<8x128xf32>
    %180 = arith.minimumf %178, %179 : vector<8x128xf32>
    %181 = arith.subf %180, %171 : vector<8x128xf32>
    %cst_32 = arith.constant 0.000000e+00 : f32
    %182 = vector.broadcast %cst_32 : f32 to vector<8x128xf32>
    %183 = arith.maximumf %181, %182 : vector<8x128xf32>
    %184 = arith.mulf %133, %158 : vector<8x128xf32>
    %185 = arith.mulf %184, %183 : vector<8x128xf32>
    %186 = vector.extract_strided_slice %5 {offsets = [3, 0], sizes = [1, 128], strides = [1, 1]} : vector<8x128xf32> to vector<1x128xf32>
    %187 = vector.extract_strided_slice %5 {offsets = [4, 0], sizes = [1, 128], strides = [1, 1]} : vector<8x128xf32> to vector<1x128xf32>
    %188 = arith.mulf %186, %187 : vector<1x128xf32>
    %189 = vector.extract_strided_slice %5 {offsets = [5, 0], sizes = [1, 128], strides = [1, 1]} : vector<8x128xf32> to vector<1x128xf32>
    %190 = arith.mulf %188, %189 : vector<1x128xf32>
    %191 = vector.extract_strided_slice %68 {offsets = [0, 0], sizes = [8, 1], strides = [1, 1]} : vector<8x3xf32> to vector<8x1xf32>
    %192 = vector.extract_strided_slice %68 {offsets = [0, 1], sizes = [8, 1], strides = [1, 1]} : vector<8x3xf32> to vector<8x1xf32>
    %193 = arith.mulf %191, %192 : vector<8x1xf32>
    %194 = vector.extract_strided_slice %68 {offsets = [0, 2], sizes = [8, 1], strides = [1, 1]} : vector<8x3xf32> to vector<8x1xf32>
    %195 = arith.mulf %193, %194 : vector<8x1xf32>
    %196 = vector.broadcast %190 : vector<1x128xf32> to vector<8x128xf32>
    %197 = vector.broadcast %195 : vector<8x1xf32> to vector<8x128xf32>
    %198 = arith.addf %196, %197 : vector<8x128xf32>
    %199 = arith.subf %198, %185 : vector<8x128xf32>
    %cst_33 = arith.constant 9.99999997E-7 : f32
    %200 = vector.broadcast %cst_33 : f32 to vector<8x128xf32>
    %201 = arith.maximumf %199, %200 : vector<8x128xf32>
    %202 = arith.divf %185, %201 : vector<8x128xf32>
    %203 = vector.extract_strided_slice %7 {offsets = [0, 0], sizes = [8, 1], strides = [1, 1]} : vector<8x24xf32> to vector<8x1xf32>
    %204 = vector.extract_strided_slice %7 {offsets = [0, 1], sizes = [8, 1], strides = [1, 1]} : vector<8x24xf32> to vector<8x1xf32>
    %205 = vector.extract_strided_slice %7 {offsets = [0, 2], sizes = [8, 1], strides = [1, 1]} : vector<8x24xf32> to vector<8x1xf32>
    %206 = vector.extract_strided_slice %7 {offsets = [0, 3], sizes = [8, 1], strides = [1, 1]} : vector<8x24xf32> to vector<8x1xf32>
    %cst_34 = arith.constant 5.000000e-01 : f32
    %207 = vector.broadcast %cst_34 : f32 to vector<8x1xf32>
    %208 = arith.mulf %207, %206 : vector<8x1xf32>
    %209 = vector.extract_strided_slice %7 {offsets = [0, 4], sizes = [8, 1], strides = [1, 1]} : vector<8x24xf32> to vector<8x1xf32>
    %cst_35 = arith.constant 5.000000e-01 : f32
    %210 = vector.broadcast %cst_35 : f32 to vector<8x1xf32>
    %211 = arith.mulf %210, %209 : vector<8x1xf32>
    %212 = vector.extract_strided_slice %7 {offsets = [0, 5], sizes = [8, 1], strides = [1, 1]} : vector<8x24xf32> to vector<8x1xf32>
    %cst_36 = arith.constant 5.000000e-01 : f32
    %213 = vector.broadcast %cst_36 : f32 to vector<8x1xf32>
    %214 = arith.mulf %213, %212 : vector<8x1xf32>
    %215 = vector.extract_strided_slice %7 {offsets = [0, 6], sizes = [8, 1], strides = [1, 1]} : vector<8x24xf32> to vector<8x1xf32>
    %216 = math.cos %215 : vector<8x1xf32>
    %217 = vector.extract_strided_slice %7 {offsets = [0, 6], sizes = [8, 1], strides = [1, 1]} : vector<8x24xf32> to vector<8x1xf32>
    %218 = math.sin %217 : vector<8x1xf32>
    %219 = vector.broadcast %49 : vector<1x128xf32> to vector<8x128xf32>
    %220 = vector.broadcast %203 : vector<8x1xf32> to vector<8x128xf32>
    %221 = arith.subf %219, %220 : vector<8x128xf32>
    %222 = vector.broadcast %52 : vector<1x128xf32> to vector<8x128xf32>
    %223 = vector.broadcast %204 : vector<8x1xf32> to vector<8x128xf32>
    %224 = arith.subf %222, %223 : vector<8x128xf32>
    %225 = vector.broadcast %216 : vector<8x1xf32> to vector<8x128xf32>
    %226 = arith.mulf %225, %221 : vector<8x128xf32>
    %227 = vector.broadcast %218 : vector<8x1xf32> to vector<8x128xf32>
    %228 = arith.mulf %227, %224 : vector<8x128xf32>
    %229 = arith.subf %226, %228 : vector<8x128xf32>
    %230 = vector.broadcast %218 : vector<8x1xf32> to vector<8x128xf32>
    %231 = arith.mulf %230, %221 : vector<8x128xf32>
    %232 = vector.broadcast %216 : vector<8x1xf32> to vector<8x128xf32>
    %233 = arith.mulf %232, %224 : vector<8x128xf32>
    %234 = arith.addf %231, %233 : vector<8x128xf32>
    %235 = math.absf %229 : vector<8x128xf32>
    %236 = math.absf %234 : vector<8x128xf32>
    %237 = vector.broadcast %55 : vector<1x128xf32> to vector<8x128xf32>
    %238 = vector.broadcast %205 : vector<8x1xf32> to vector<8x128xf32>
    %239 = arith.subf %237, %238 : vector<8x128xf32>
    %240 = math.absf %239 : vector<8x128xf32>
    %241 = vector.broadcast %208 : vector<8x1xf32> to vector<8x128xf32>
    %242 = arith.cmpf ole, %235, %241 : vector<8x128xf32>
    %243 = vector.broadcast %211 : vector<8x1xf32> to vector<8x128xf32>
    %244 = arith.cmpf ole, %236, %243 : vector<8x128xf32>
    %245 = arith.andi %242, %244 : vector<8x128xi1>
    %246 = vector.broadcast %214 : vector<8x1xf32> to vector<8x128xf32>
    %247 = arith.cmpf olt, %240, %246 : vector<8x128xf32>
    %248 = arith.andi %245, %247 : vector<8x128xi1>
    %cst_37 = arith.constant 2.500000e+00 : f32
    %249 = vector.broadcast %cst_37 : f32 to vector<8x1xf32>
    %250 = arith.mulf %249, %208 : vector<8x1xf32>
    %251 = vector.broadcast %250 : vector<8x1xf32> to vector<8x128xf32>
    %252 = arith.cmpf ole, %235, %251 : vector<8x128xf32>
    %cst_38 = arith.constant 2.500000e+00 : f32
    %253 = vector.broadcast %cst_38 : f32 to vector<8x1xf32>
    %254 = arith.mulf %253, %211 : vector<8x1xf32>
    %255 = vector.broadcast %254 : vector<8x1xf32> to vector<8x128xf32>
    %256 = arith.cmpf ole, %236, %255 : vector<8x128xf32>
    %257 = arith.andi %252, %256 : vector<8x128xi1>
    %cst_39 = arith.constant 6.250000e+00 : f32
    %258 = vector.broadcast %cst_39 : f32 to vector<8x1xf32>
    %259 = arith.mulf %258, %214 : vector<8x1xf32>
    %260 = vector.broadcast %259 : vector<8x1xf32> to vector<8x128xf32>
    %261 = arith.cmpf olt, %240, %260 : vector<8x128xf32>
    %262 = arith.andi %257, %261 : vector<8x128xi1>
    %263 = tpu.iota {dimensions = array<i32: 0>} : vector<8x1xi32>
    %264 = vector.broadcast %1 : i32 to vector<8x1xi32>
    %265 = arith.cmpi slt, %263, %264 : vector<8x1xi32>
    %266 = vector.broadcast %265 : vector<8x1xi1> to vector<8x128xi1>
    %267 = arith.andi %248, %266 : vector<8x128xi1>
    %268 = vector.broadcast %265 : vector<8x1xi1> to vector<8x128xi1>
    %269 = arith.andi %262, %268 : vector<8x128xi1>
    %270 = arith.ori %267, %269 : vector<8x128xi1>
    %cst_40 = arith.constant 1.000000e+00 : f32
    %cst_41 = arith.constant 0.000000e+00 : f32
    %271 = vector.broadcast %cst_40 : f32 to vector<8x128xf32>
    %272 = vector.broadcast %cst_41 : f32 to vector<8x128xf32>
    %273 = arith.select %270, %271, %272 : vector<8x128xi1>, vector<8x128xf32>
    %cst_42 = arith.constant dense<0xFF800000> : vector<128xf32>
    %274 = vector.multi_reduction <maximumf>, %273, %cst_42 [0] : vector<8x128xf32> to vector<128xf32>
    %275 = vector.shape_cast %274 : vector<128xf32> to vector<1x128xf32>
    %cst_43 = arith.constant 0.000000e+00 : f32
    %276 = vector.broadcast %cst_43 : f32 to vector<1x128xf32>
    %277 = arith.cmpf ogt, %275, %276 : vector<1x128xf32>
    %278 = arith.andi %267, %269 : vector<8x128xi1>
    %279 = arith.addf %108, %27 : vector<8x128xf32>
    %280 = arith.subf %279, %202 : vector<8x128xf32>
    %cst_44 = arith.constant 0.000000e+00 : f32
    %cst_45 = arith.constant 1.000000e+02 : f32
    %281 = vector.broadcast %cst_44 : f32 to vector<8x128xf32>
    %282 = vector.broadcast %cst_45 : f32 to vector<8x128xf32>
    %283 = arith.select %278, %281, %282 : vector<8x128xi1>, vector<8x128xf32>
    %284 = arith.addf %280, %283 : vector<8x128xf32>
    %cst_46 = arith.constant 0.000000e+00 : f32
    %cst_47 = arith.constant 1.000000e+04 : f32
    %285 = vector.broadcast %cst_46 : f32 to vector<1x128xf32>
    %286 = vector.broadcast %cst_47 : f32 to vector<1x128xf32>
    %287 = arith.select %277, %285, %286 : vector<1x128xi1>, vector<1x128xf32>
    %288 = vector.broadcast %287 : vector<1x128xf32> to vector<8x128xf32>
    %289 = arith.addf %284, %288 : vector<8x128xf32>
    %cst_48 = arith.constant 1.000000e+08 : f32
    %290 = vector.shape_cast %265 : vector<8x1xi1> to vector<8x1xi1>
    %291 = vector.broadcast %290 : vector<8x1xi1> to vector<8x128xi1>
    %292 = vector.broadcast %cst_48 : f32 to vector<8x128xf32>
    %293 = arith.select %291, %289, %292 : vector<8x128xi1>, vector<8x128xf32>
    %c0_49 = arith.constant 0 : index
    %c0_50 = arith.constant 0 : index
    %c0_51 = arith.constant 0 : index
    %294 = vector.load %arg6[%c0_49, %c0_50, %c0_51] : memref<1x8x128xf32, #tpu.memory_space<vmem>>, vector<1x8x128xf32>
    %295 = vector.shape_cast %294 : vector<1x8x128xf32> to vector<8x128xf32>
    %296 = vector.shape_cast %293 : vector<8x128xf32> to vector<1x8x128xf32>
    tpu.vector_store %arg6[%c0_49, %c0_50, %c0_51], %296 {strides = array<i32>} : memref<1x8x128xf32, #tpu.memory_space<vmem>>, vector<1x8x128xf32>,
    %cst_52 = arith.constant 0.000000e+00 : f32
    %297 = vector.shape_cast %265 : vector<8x1xi1> to vector<8x1xi1>
    %298 = vector.broadcast %297 : vector<8x1xi1> to vector<8x128xi1>
    %299 = vector.broadcast %cst_52 : f32 to vector<8x128xf32>
    %300 = arith.select %298, %202, %299 : vector<8x128xi1>, vector<8x128xf32>
    %c0_53 = arith.constant 0 : index
    %c0_54 = arith.constant 0 : index
    %c0_55 = arith.constant 0 : index
    %301 = vector.load %arg7[%c0_53, %c0_54, %c0_55] : memref<1x8x128xf32, #tpu.memory_space<vmem>>, vector<1x8x128xf32>
    %302 = vector.shape_cast %301 : vector<1x8x128xf32> to vector<8x128xf32>
    %303 = vector.shape_cast %300 : vector<8x128xf32> to vector<1x8x128xf32>
    tpu.vector_store %arg7[%c0_53, %c0_54, %c0_55], %303 {strides = array<i32>} : memref<1x8x128xf32, #tpu.memory_space<vmem>>, vector<1x8x128xf32>,
    return
  }
  func.func @transform_0(%arg0: i32, %arg1: i32, %arg2: memref<2xi32, #tpu.memory_space<smem>>) -> (i32, i32, i32) {
    %c0_i32 = arith.constant 0 : i32
    %c0_i32_0 = arith.constant 0 : i32
    return %arg0, %c0_i32, %arg1 : i32, i32, i32
  }
  func.func @transform_1(%arg0: i32, %arg1: i32, %arg2: memref<2xi32, #tpu.memory_space<smem>>) -> (i32, i32, i32) {
    %c0_i32 = arith.constant 0 : i32
    %c0_i32_0 = arith.constant 0 : i32
    return %arg0, %c0_i32, %arg1 : i32, i32, i32
  }
  func.func @transform_2(%arg0: i32, %arg1: i32, %arg2: memref<2xi32, #tpu.memory_space<smem>>) -> (i32, i32, i32) {
    %c0_i32 = arith.constant 0 : i32
    %c0_i32_0 = arith.constant 0 : i32
    %c0_i32_1 = arith.constant 0 : i32
    return %arg0, %c0_i32, %c0_i32_0 : i32, i32, i32
  }
  func.func @transform_3(%arg0: i32, %arg1: i32, %arg2: memref<2xi32, #tpu.memory_space<smem>>) -> (i32, i32, i32) {
    %c0_i32 = arith.constant 0 : i32
    %c0_i32_0 = arith.constant 0 : i32
    return %arg0, %c0_i32, %arg1 : i32, i32, i32
  }
  func.func @transform_4(%arg0: i32, %arg1: i32, %arg2: memref<2xi32, #tpu.memory_space<smem>>) -> (i32, i32, i32) {
    %c0_i32 = arith.constant 0 : i32
    %c0_i32_0 = arith.constant 0 : i32
    return %arg0, %c0_i32, %arg1 : i32, i32, i32
  }
}

</mosaic_0001>

<bundles_post_ra>
// kernel: _matcher_device.1
= control target key start
LH: loop header
LB: loop body
LE: loop exit
PB: predicated region body
PF: predicated region fallthrough
CT: control target
= control target key end

     0   :  { %s1733_s0 = inlined_call_operand.vmem [shape: s32[2], index: 0, kind: input, shape index: {}]   ;;  %s1734_s1 = inlined_call_operand.vmem [shape: f32[2,8,128], index: 1, kind: input, shape index: {}]   ;;  %s1735_s2 = inlined_call_operand.vmem [shape: f32[2,8,128], index: 2, kind: input, shape index: {}]   ;;  %s1736_s3 = inlined_call_operand.vmem [shape: f32[2,8,24], index: 3, kind: input, shape index: {}]   ;;  %s1737_s4 = inlined_call_operand.hbm [shape: f32[2,8,128], index: 4, kind: output, shape index: {0}]   ;;  %s1738_s5 = inlined_call_operand.vmem [shape: f32[2,8,128], index: 5, kind: output, shape index: {1}]  }
   0x1   :  { %s11_s20 = sshll.u32 %s1733_s0, 4  ;;  %s12_s20 = int_to_ptr.vmem [resolvable:$true] %s11_s20 }
   0x2   :  { %s1255_s21 = scalar_lea.vmem %s12_s20, 16  ;;  %p1260_p1 = scmp.lt.s32.totalorder %s12_s20, %s12_s20 }
   0x3   :  { %p1256_p0 = scmp.ne.s32.totalorder %s12_s20, %s1255_s21  ;;  %p1261_p2 = scmp.lt.s32.totalorder %s1255_s21, %s1255_s21 }
   0x5   :  { %p1262_p3 = por %p1261_p2, %p1260_p1 }
   0x7   :  { %p1263_p4 = pnand %p1262_p3, %p1256_p0 }
   0x9   :  { %1266 = shalt.err (!%p1263_p4)  }
   0xa   :  { %s1349_s22 = smov [#allocation3]  }
   0xb   :  { %14 = dma.vmem_to_smem %s12_s20, 16, %s1349_s22, [#allocation2] }
   0xc   :  { %1319 = dma.done.wait [#allocation2], 16 }
   0xd   :  { %1320 = vsyncadd [#allocation2], 4294967280 }
   0xe   :  { %16 = sfence }
   0xf   :  { %17 = vsyncpa [#allocation5], 0 }
  0x10   :  { %19 = vsyncpa [#allocation5 + $0x1], 0  ;;  %s1411_s23 = smov 0   ;;  %s1413_s24 = smov 0  }
  0x11   :  { %s1415_s0 = smov 0   ;;  %s1417_s25 = smov 0  }
  0x12   :  { %s1419_s26 = smov 0   ;;  %s1421_s27 = smov 0  }
  0x13 LB: > { %s1097_s28 = sadd.s32 4294967295, %s1347_s27   ;;  %s1098_s29 = sadd.s32 4294967294, %s1347_s27   ;;  %s1347_s27 = sphi %s1421_s27, %s25_s27   ;;  %s1343_s26 = sphi %s1419_s26, %s1755_s26   ;;  %s1339_s25 = sphi %s1417_s25, %s1754_s25   ;;  %s1335_s0 = sphi %s1415_s0, %s1753_s0   ;;  %s1331_s24 = sphi %s1413_s24, %s1752_s24   ;;  %s1327_s23 = sphi %s1411_s23, %s1751_s23  }
  0x14   : > { %s37_s30 = sadd.s32 1, %s1343_s26  ;;  %s128_s6 = sadd.s32 1, %s1335_s0 }
  0x15   : > { %p39_p5 = scmp.ge.s32.totalorder %s37_s30, 2  ;;  %p138_p6 = scmp.ne.s32.totalorder %s1335_s0, %s1331_s24 }
  0x16   : > { %p139_p7 = scmp.eq.s32.totalorder %s1097_s28, 1  ;;  %p144_p8 = scmp.ne.s32.totalorder %s1331_s24, %s1327_s23 }
  0x17   : > { %s1757_s30 = smov (%p39_p5, %s37_s30), 0  ;;  %p145_p10 = scmp.eq.s32.totalorder %s1098_s29, 1 }
  0x18   : > { %p1451_p9 = por %p139_p7, %p138_p6  ;;  %s123_s8 = ssub.s32 %s1343_s26, %s1757_s30 }
  0x19   : > { %p1101_p11 = scmp.ge.s32.totalorder %s1347_s27, 1  ;;  %p126_p12 = scmp.eq.s32.totalorder %s123_s8, 0 }
  0x1a   : > { %p1458_p13 = por %p145_p10, %p144_p8  ;;  %p218_p0 = scmp.lt.s32.totalorder %s1347_s27, 3 }
  0x1b   : > { %s1464_s10 = scalar_select %p126_p12, %s1335_s0, %s128_s6  }
  0x1c   : > { %p219_p1 = pnand %p1101_p11, %p218_p0 }
  0x1d   : > { %p264_p2 = scmp.lt.s32.totalorder (!%p219_p1), %s1339_s25, 1  ;;  %v1350_v0 = vmov (!%p219_p1), 7   ;;  %v1351_v1 = vmov (!%p219_p1), 0.0   ;;  %s1352_s19 = smov (!%p219_p1), 117   ;;  %vm1354_vm0 = vmmov (!%p219_p1), 0   ;;  %v1356_v21 = vmov (!%p219_p1), 11  }
  0x1e   : > { %222 = sbr.rel (%p219_p1) target bundleno = 497 (0x1f1), region = 32  ;;  %1217 = vset.pattern.permute.xlu0 (!%p219_p1), %v1350_v0  ;;  %1123 = vmatprep.subr.mxu0 (!%p219_p1), %v1351_v1  ;;  %s1353_s20 = smov (!%p219_p1), 120   ;;  %v1357_v23 = vmov (!%p219_p1), 2102212464   ;;  %v1358_v25 = vmov (!%p219_p1), 920167782  }
  0x1f   : > { %1125 = vmatprep.mubr.msk.f32.mxu0 (!%p219_p1), %vm1354_vm0, %v1351_v1  ;;  %s1355_s21 = smov (!%p219_p1), 114   ;;  %1218 = vset.pattern.permute.xlu1 (!%p219_p1), %v1356_v21  ;;  %v1359_v30 = vmov (!%p219_p1), 1326507024   ;;  %v1360_v33 = vmov (!%p219_p1), 683565275   ;;  %v1363_v60 = vmov (!%p219_p1), 12  }
  0x20   : > { %v1361_v35 = vmov (!%p219_p1), 2475754826   ;;  %v1362_v38 = vmov (!%p219_p1), 2131351028   ;;  %vm318_vm10 = vcmask (!%p219_p1), 64512   ;;  %s1364_s22 = smov (!%p219_p1), 127  }
  0x21   : > { %s1365_s28 = smov (!%p219_p1), 125   ;;  %s1366_s29 = smov (!%p219_p1), 126  }
  0x22   : > { %s1615_s13 = sld [smem:[#allocation3 + %s1339_s25]] (!%p219_p1)  ;;  %s252_s17 = sand.u32 (!%p219_p1), 1, %s1331_s24  }
  0x23   : > { %s1377_s6 = smov (!%p219_p1), [#allocation4]  }
  0x24   : > { %s1271_s8 = sshll.u32 (!%p219_p1), %s1377_s6, 4  ;;  %s1272_s8 = int_to_ptr.vmem [resolvable:$false] %s1271_s8 }
  0x25   : > { %s265_s11 = scalar_select %p264_p2, %s1339_s25, 1 }
  0x27   : > { %s1469_s12 = sshll.u32 %s265_s11, 3 }
  0x28   : > { %s281_s15 = scalar_lea.vmem %s1736_s3, %s1469_s12  ;;  %s270_s18 = scalar_lea.vmem %s1734_s1, %s1469_s12 }
  0x29   : > { %v1479_v2 = vld [vmem:[%s281_s15] sm:$0xff]  ;;  %s277_s11 = scalar_lea.vmem %s1735_s2, %s1469_s12  ;;  %s288_s16 = scalar_lea.vmem %s1738_s5, %s1469_s12 }
  0x2a   : > { %v290_v3 = vld [vmem:[%s270_s18] sm:$0xff]  ;;  %v1128_v4 = vtrunc.f32 %v1479_v2  ;;  %1243 = vrcp.f32 %v1479_v2  ;;  %433 = vrot.lane.b32.xlu1 %v1479_v2, %s1352_s19  ;;  %v626_v6 = vand.u32 2139095040, %v1479_v2  ;;  %v623_v27 = vand.u32 2147483647, %v1479_v2  ;;  %s1102_s12 = sshll.u32 %s252_s17, 3  ;;  %s1118_s18 = sshll.u32 %s1339_s25, 7 }
  0x2b   : > { %v293_v5 = vrot.slane %v290_v3, 4  ;;  %vm625_vm8 = vcmp.lt.s32.totalorder %v1479_v2, 0  ;;  %s944_s25 = scalar_lea.sflag [#allocation5], %s252_s17 }
  0x2c   : > { %v1129_v7 = vcvt.f32.s32 %v1128_v4  ;;  %v627_v9 = vshrl.u32 %v626_v6, 23  ;;  %v630_v43 = vand.u32 8388607, %v623_v27  ;;  %vm1519_vm9 = vcmp.le.f32.partialorder %v623_v27, 0.7853982 }
  0x2d   : > { %v294_v8 = vmax.f32 %v290_v3, %v293_v5 }
  0x2e   : > { %313 = vperm.xlu0 %1217, %v1129_v7   ;;  %416 = vrot.lane.b32.xlu1 %v1479_v2, %s1353_s20  ;;  %v1109_v11 = vadd.s32 4294967169, %v627_v9  ;;  %v631_v49 = vor.u32 8388608, %v630_v43 }
  0x2f   : > { %v295_v10 = vrot.slane %v294_v8, 2 }
  0x30   : > { %v633_v13 = vadd.s32 1, %v1109_v11  ;;  %v671_v55 = vshll.u32 %v631_v49, 8 }
  0x31   : > { %v296_v12 = vmax.f32 %v294_v8, %v295_v10 }
  0x32   : > { %429 = vrot.lane.b32.xlu1 %v1479_v2, %s1355_s21  ;;  %vm634_vm1 = vcmp.gt.s32.totalorder %v633_v13, 0  ;;  %1219 = vset.pattern.permute.xlu0 %v1363_v60 }
  0x33   : > { %v297_v14 = vrot.slane %v296_v12, 1  ;;  %v635_v18 = vsel %vm634_vm1, %v633_v13, 0  ;;  %vm715_vm1 = vweird.f32 %v1479_v2 }
  0x34   : > { %v1244_v15 = vpop.eup %1243  ;;  %v637_v20 = vand.u32 31, %v635_v18  ;;  %v636_v28 = vshrl.u32 %v635_v18, 5 }
  0x35   : > { %v298_v16 = vmax.f32 %v296_v12, %v297_v14  ;;  %425 = vrot.lane.b32.xlu0 %v1244_v15, %s1353_s20 }
  0x36   : > { %v638_v22 = vsub.s32 32, %v637_v20  ;;  %v649_v24 = vshll.u32 %v1357_v23, %v637_v20  ;;  %v652_v29 = vshll.u32 %v1358_v25, %v637_v20  ;;  %v640_v34 = vshll.u32 %v1360_v33, %v637_v20 }
  0x37   : > { %v299_v17 = vsub.f32 %v290_v3, %v298_v16  ;;  %v643_v36 = vshll.u32 %v1361_v35, %v637_v20  ;;  %v646_v40 = vshll.u32 %v1362_v38, %v637_v20  ;;  %vm658_vm2 = vcmp.lt.s32.totalorder %v636_v28, 4 }
  0x38   : > { %v650_v26 = vshrl.u32 %v1358_v25, %v638_v22  ;;  %v653_v31 = vshrl.u32 %v1359_v30, %v638_v22  ;;  %v641_v37 = vshrl.u32 %v1361_v35, %v638_v22  ;;  %v644_v39 = vshrl.u32 %v1362_v38, %v638_v22 }
  0x39   : > { %v300_v19 = vmul.f32 1.442695, %v299_v17  ;;  %421 = vrot.lane.b32.xlu0 %v1244_v15, %s1352_s19  ;;  %v647_v41 = vshrl.u32 %v1357_v23, %v638_v22  ;;  %vm655_vm3 = vcmp.lt.s32.totalorder %v636_v28, 1  ;;  %vm657_vm4 = vcmp.lt.s32.totalorder %v636_v28, 3  ;;  %s254_s19 = scalar_lea.vmem [#allocation4], %s1102_s12 }
  0x3a   : > { %v651_v42 = vor.u32 %v650_v26, %v649_v24  ;;  %v654_v44 = vor.u32 %v653_v31, %v652_v29  ;;  %v642_v45 = vor.u32 %v641_v37, %v640_v34  ;;  %v645_v46 = vor.u32 %v644_v39, %v643_v36  ;;  %s965_s20 = sshll.u32 %s254_s19, 4  ;;  %s1686_s20 = int_to_ptr.vmem [resolvable:$true] %s965_s20 }
  0x3b   : > { %1245 = vpow2.f32 %v300_v19  ;;  %v648_v47 = vor.u32 %v647_v41, %v646_v40  ;;  %vm656_vm5 = vcmp.lt.s32.totalorder %v636_v28, 2  ;;  %v639_v61 = vshrl.u32 %v1360_v33, %v638_v22  ;;  %p1274_p6 = scmp.lt.s32.totalorder %s1686_s20, %s1272_s8 }
  0x3c   : > { %v664_v48 = vsel %vm658_vm2, %v651_v42, 920167782  ;;  %v668_v50 = vsel %vm658_vm2, %v654_v44, 1326507024  ;;  %v663_v51 = vsel %vm655_vm3, %v642_v45, %v645_v46  ;;  %v310_v34 = vlaneseq }
  0x3d   : > { %v665_v52 = vsel %vm657_vm4, %v648_v47, %v664_v48  ;;  %v667_v53 = vsel %vm655_vm3, %v645_v46, %v648_v47  ;;  %v669_v54 = vsel %vm657_vm4, %v651_v42, %v668_v50  ;;  %v660_v0 = vsel %vm658_vm2, %v648_v47, 2102212464 }
  0x3e   : > { %v666_v56 = vsel %vm656_vm5, %v663_v51, %v665_v52  ;;  %v670_v57 = vsel %vm656_vm5, %v667_v53, %v669_v54  ;;  %v659_v3 = vsel %vm655_vm3, %v639_v61, %v642_v45  ;;  %v661_v4 = vsel %vm657_vm4, %v645_v46, %v660_v0 }
  0x3f   : > { %v1502_v58 = vmul.u32.u64.low %v671_v55, %v666_v56  ;;  %v1503_v59 = vmul.u32.u64.high %v671_v55, %v666_v56, %v1502_v58  ;;  %v1505_v62 = vmul.u32.u64.low %v671_v55, %v670_v57  ;;  %v1506_v63 = vmul.u32.u64.high %v671_v55, %v670_v57, %v1505_v62 }
  0x40   : > { %v662_v5 = vsel %vm656_vm5, %v659_v3, %v661_v4  ;;  %v311_v37 = vand.u32 127, %v310_v34  ;;  %v1369_v3 = vmov 1  }
  0x41   : > { %v681_v6 = vadd.s32 1, %v1503_v59  ;;  %vm680_vm6 = vc.u32 %v1506_v63, %v1502_v58  ;;  %v678_v7 = vmul.u32 %v671_v55, %v662_v5  ;;  %v679_v20 = vadd.s32 %v1502_v58, %v1506_v63 }
  0x42   : > { %v1367_v55 = vmov 13  }
  0x43   : > { %v682_v8 = vsel %vm680_vm6, %v681_v6, %v1503_v59  ;;  %v1368_v59 = vmov 0  }
  0x44   : > { %v683_v9 = vadd.s32 %v682_v8, %v678_v7  ;;  %v1370_v7 = vmov 6  }
  0x45   : > { %v1489_v32 = vpop.eup %1245 }
  0x46   : > { %1124 = vmatpush3.msra.mxu0 %v1489_v32  ;;  %v684_v10 = vadd.s32 536870912, %v683_v9 }
  0x48   : > { %v685_v11 = vshrl.u32 %v684_v10, 30  ;;  %v1371_v10 = vmov 4  }
  0x4a   : > { %v686_v12 = vshll.u32 %v685_v11, 30  ;;  %v709_v41 = vsub.s32 4, %v685_v11 }
  0x4c   : > { %v687_v13 = vsub.s32 %v683_v9, %v686_v12  ;;  %v710_v44 = vsel %vm625_vm8, %v709_v41, %v685_v11  ;;  %v622_v9 = vmul.f32 0.5, %v1479_v2  ;;  %v1372_v11 = vmov 2  }
  0x4d   : > { %v712_v47 = vsel %vm1519_vm9, 0, %v710_v44  ;;  %v1373_v12 = vmov 3  }
  0x4e   : > { %v689_v14 = vsub.s32 0, %v687_v13  ;;  %v716_v50 = vand.u32 3, %v712_v47  ;;  %v819_v51 = vadd.s32 3, %v712_v47 }
  0x50   : > { %v1110_v15 = vmin.u32 %v689_v14, %v687_v13  ;;  %vm718_vm12 = vcmp.eq.s32.totalorder %v716_v50, 0  ;;  %vm721_vm13 = vcmp.eq.s32.totalorder %v716_v50, 2  ;;  %v820_v54 = vand.u32 3, %v819_v51 }
  0x51   : > { %vm717_vm14 = vcmp.lt.s32.totalorder %v716_v50, 2 }
  0x52   : > { %v691_v16 = vclz %v1110_v15  ;;  %vm822_vm15 = vcmp.eq.s32.totalorder %v820_v54, 0  ;;  %vm825_vm0 = vcmp.eq.s32.totalorder %v820_v54, 2  ;;  %vm821_vm2 = vcmp.lt.s32.totalorder %v820_v54, 2 }
  0x54   : > { %v1111_v17 = vadd.s32 4294967294, %v691_v16 }
  0x56   : > { %vm1112_vm7 = vcmp.lt.s32.totalorder %v1111_v17, 0 }
  0x57   : > { %v694_v18 = vsel %vm1112_vm7, 0, %v1111_v17 }
  0x58   : > { %v699_v19 = vsub.s32 4294967266, %v694_v18  ;;  %v695_v21 = vsub.s32 32, %v694_v18  ;;  %v696_v23 = vshll.u32 %v687_v13, %v694_v18  ;;  %v894_v13 = vmul.f32 2.5, %v622_v9 }
  0x5a   : > { %v700_v22 = vadd.s32 127, %v699_v19  ;;  %v697_v24 = vshrl.u32 %v679_v20, %v695_v21  ;;  %v1374_v20 = vmov 5  }
  0x5c   : > { %v701_v25 = vshll.u32 %v700_v22, 23  ;;  %v698_v26 = vor.u32 %v697_v24, %v696_v23  ;;  %v907_v24 = vmul.f32 6.25, %v622_v9 }
  0x5e   : > { %v702_v28 = vor.u32 4788187, %v701_v25  ;;  %v705_v30 = vcvt.s32.f32 %v698_v26 }
  0x60   : > { %v703_v29 = vand.u32 2147483647, %v702_v28 }
  0x62   : > { %v706_v31 = vmul.f32 %v705_v30, %v703_v29 }
  0x64   : > { %v707_v33 = vxor.u32 2147483648, %v706_v31 }
  0x66   : > { %v708_v36 = vsel %vm625_vm8, %v707_v33, %v706_v31 }
  0x67   : > { %v711_v38 = vsel %vm1519_vm9, %v1479_v2, %v708_v36 }
  0x68   : > { %1247 = vcosq.f32 %v711_v38 }
  0x69   : > { %1249 = vsinq.f32 %v711_v38 }
  0x72   : > { %v1248_v48 = vpop.eup %1247 }
  0x73   : > { %v1250_v49 = vpop.eup %1249  ;;  %v722_v53 = vxor.u32 2147483648, %v1248_v48 }
  0x74   : > { %v719_v52 = vxor.u32 2147483648, %v1250_v49 }
  0x75   : > { %v723_v57 = vsel %vm721_vm13, %v722_v53, %v1250_v49  ;;  %v827_v63 = vsel %vm825_vm0, %v722_v53, %v1250_v49 }
  0x76   : > { %v720_v56 = vsel %vm718_vm12, %v1248_v48, %v719_v52  ;;  %v824_v62 = vsel %vm822_vm15, %v1248_v48, %v719_v52 }
  0x77   : > { %v724_v60 = vsel %vm717_vm14, %v720_v56, %v723_v57  ;;  %v828_v5 = vsel %vm821_vm2, %v824_v62, %v827_v63 }
  0x78   : > { %v725_v4 = vsel %vm715_vm1, nan, %v724_v60  ;;  %v829_v8 = vsel %vm715_vm1, nan, %v828_v5 }
  0x9c   : > { %v434_v42 = vpop.permute.xlu1 %433 }
  0xa0   : > { %v417_v58 = vpop.permute.xlu1 %416 }
  0xa1   : > { %v419_v61 = vsub.f32 %v1479_v2, %v417_v58 }
  0xa4   : > { %v430_v14 = vpop.permute.xlu1 %429 }
  0xad   : > { %v314_v39 = vpop.permute.xlu0 %313 }
  0xae   : > { %vm315_vm11 = vcmp.eq.s32.totalorder %v314_v39, %v311_v37 }
  0xaf   : > { %v1107_v40 = vsel %vm315_vm11, 1.0, %v1351_v1 }
  0xb0   : > { %1126 = vmatmul.mubr.msk.f32.vlgmr.msra.gmra.mrb[0].mxu0 %vm318_vm10, %v1107_v40  ;;  %v1574_v40 = vshrl.u32 %v310_v34, 7 }
  0xb1   : > { %v426_v27 = vpop.permute.xlu0 %425 }
  0xb2   : > { %v1531_v43 = vmul.f32 %v426_v27, %v1479_v2  ;;  %v1590_v34 = vsub.s32 1, %v1574_v40 }
  0xb4   : > { %v1536_v45 = vmul.f32 %v434_v42, %v1531_v43 }
  0xb5   : > { %v422_v0 = vpop.permute.xlu0 %421 }
  0xb6   : > { %600 = vrot.lane.b32.xlu1 %v1536_v45, %s1364_s22  ;;  %v520_v46 = vmul.f32 0.5, %v1536_v45  ;;  %v424_v6 = vmul.f32 %v422_v0, %v419_v61  ;;  %v1602_v61 = vsub.s32 2, %v1574_v40 }
  0xb8   : > { %522 = vrot.lane.b32.xlu0 %v520_v46, %s1365_s28  ;;  %v432_v15 = vmul.f32 %v430_v14, %v424_v6  ;;  %v1586_v46 = vsub.s32 0, %v1574_v40  ;;  %s1684_s28 = scalar_lea.hbm %s1737_s4, %s1118_s18 }
  0xba   : > { %398 = vperm.xlu1 %1218, %v1479_v2  }
  0xbc   : > { %604 = vrot.lane.b32.xlu0 %v1536_v45, %s1366_s29  ;;  %s1267_s29 = scalar_lea.vmem %s1686_s20, 128 }
  0xbd   : > { %p1268_p3 = scmp.ne.s32.totalorder %s1686_s20, %s1267_s29 }
  0xbe   : > { %1220 = vset.pattern.permute.xlu1 %v1367_v55 }
  0xbf   : > { %409 = vperm.xlu1 %1220, %v1479_v2   ;;  %p1269_p4 = pnand %p1268_p3, %p1451_p9 }
  0xc0   : > { %403 = vperm.xlu0 %1219, %v1479_v2  }
  0xc1   : > { %p1270_p5 = pneg %p1269_p4 }
  0xc3   : > { %1221 = vset.pattern.permute.xlu1 %v1368_v59 }
  0xc4   : > { %835 = vperm.xlu1 %1221, %v1479_v2   ;;  %1222 = vset.pattern.permute.xlu0 %v1369_v3 }
  0xc5   : > { %844 = vperm.xlu0 %1222, %v1479_v2  }
  0xc8   : > { %1223 = vset.pattern.permute.xlu1 %v1370_v7 }
  0xc9   : > { %850 = vperm.xlu1 %1223, %v725_v4   ;;  %453 = vperm.xlu0 %1222, %v424_v6  }
  0xcd   : > { %856 = vperm.xlu1 %1223, %v829_v8   ;;  %1228 = vset.pattern.permute.xlu0 %v1371_v10 }
  0xce   : > { %883 = vperm.xlu0 %1228, %v622_v9  }
  0xd1   : > { %1224 = vset.pattern.permute.xlu1 %v1372_v11 }
  0xd2   : > { %871 = vperm.xlu1 %1224, %v1479_v2   ;;  %1230 = vset.pattern.permute.xlu0 %v1368_v59 }
  0xd6   : > { %1225 = vset.pattern.permute.xlu1 %v1368_v59 }
  0xd7   : > { %443 = vperm.xlu1 %1225, %v424_v6  }
  0xdb   : > { %1226 = vset.pattern.permute.xlu1 %v1372_v11 }
  0xdc   : > { %464 = vperm.xlu1 %1226, %v424_v6  }
  0xe0   : > { %1227 = vset.pattern.permute.xlu1 %v1373_v12 }
  0xe1   : > { %878 = vperm.xlu1 %1227, %v622_v9  }
  0xe5   : > { %897 = vperm.xlu1 %1227, %v894_v13  }
  0xe9   : > { %1229 = vset.pattern.permute.xlu1 %v1368_v59 }
 0x128   : > { %v601_v19 = vpop.permute.xlu1 %600 }
 0x129   : > { %v603_v22 = vmul.f32 %v601_v19, %v1536_v45 }
 0x12a   : > { %v523_v16 = vpop.permute.xlu0 %522 }
 0x12b   : > { %v525_v17 = vsub.f32 %v432_v15, %v523_v16  ;;  %v537_v18 = vadd.f32 %v523_v16, %v432_v15 }
 0x12d   : > { %544 = vperm.xlu0 %1230, %v537_v18   ;;  %532 = vperm.xlu1 %1229, %v525_v17  }
 0x12e   : > { %v605_v21 = vpop.permute.xlu0 %604 }
 0x12f   : > { %v607_v23 = vmul.f32 %v605_v21, %v603_v22 }
 0x131   : > { %1232 = vset.pattern.permute.xlu0 %v1372_v11  ;;  %1231 = vset.pattern.permute.xlu1 %v1369_v3 }
 0x132   : > { %575 = vperm.xlu0 %1232, %v525_v17   ;;  %555 = vperm.xlu1 %1231, %v525_v17  }
 0x136   : > { %1235 = vset.pattern.permute.xlu0 %v1374_v20  ;;  %564 = vperm.xlu1 %1231, %v537_v18  }
 0x137   : > { %889 = vperm.xlu0 %1235, %v622_v9  }
 0x139   : > { %v399_v25 = vpop.permute.xlu1 %398 }
 0x13a   : > { %1233 = vset.pattern.permute.xlu1 %v1372_v11 }
 0x13b   : > { %1238 = vset.pattern.permute.xlu0 %v1373_v12  ;;  %584 = vperm.xlu1 %1233, %v537_v18  }
 0x13c   : > { %614 = vperm.xlu0 %1238, %v607_v23  }
 0x13e   : > { %v410_v26 = vpop.permute.xlu1 %409 }
 0x13f   : > { %1234 = vset.pattern.permute.xlu1 %v1371_v10  ;;  %v404_v37 = vpop.permute.xlu0 %403  ;;  %v411_v54 = vrot.slane %v410_v26, 6 }
 0x140   : > { %902 = vperm.xlu1 %1234, %v894_v13   ;;  %1239 = vset.pattern.permute.xlu0 %v1371_v10  ;;  %v405_v27 = vrot.slane %v404_v37, 7 }
 0x141   : > { %487 = vperm.xlu0 %1239, %v1531_v43  }
 0x143   : > { %v836_v28 = vpop.permute.xlu1 %835 }
 0x144   : > { %1236 = vset.pattern.permute.xlu1 %v1374_v20  ;;  %v845_v39 = vpop.permute.xlu0 %844 }
 0x145   : > { %910 = vperm.xlu1 %1236, %v907_v24   ;;  %1242 = vset.pattern.permute.xlu0 %v1374_v20 }
 0x148   : > { %v851_v30 = vpop.permute.xlu1 %850 }
 0x149   : > { %1237 = vset.pattern.permute.xlu1 %v1373_v12  ;;  %v302_v12 = vrot.slane %v1489_v32, 4 }
 0x14a   : > { %476 = vperm.xlu1 %1237, %v1531_v43  }
 0x14b   : > { %v303_v23 = vadd.f32 %v1489_v32, %v302_v12 }
 0x14c   : > { %v857_v33 = vpop.permute.xlu1 %856 }
 0x14e   : > { %1240 = vset.pattern.permute.xlu1 %v1374_v20 }
 0x14f   : > { %498 = vperm.xlu1 %1240, %v1531_v43   ;;  %v1581_v43 = vpop.permute.xlu0 %453 }
 0x151   : > { %v872_v35 = vpop.permute.xlu1 %871 }
 0x153   : > { %1241 = vset.pattern.permute.xlu1 %v1370_v7  ;;  %v884_v49 = vpop.permute.xlu0 %883 }
 0x154   : > { %509 = vperm.xlu1 %1241, %v1479_v2   ;;  %v1571_v2 = vld [vmem:[%s277_s11] sm:$0xff]  ;;  %s1273_s11 = scalar_lea.vmem %s1272_s8, 256 }
 0x155   : > { %v1577_v41 = vmul.f32 0.0078125, %v1571_v2  ;;  %v515_v44 = vmul.f32 0.5, %v1571_v2  ;;  %v1597_v53 = vmul.f32 0.125, %v1571_v2  ;;  %v593_v3 = vrot.slane %v1571_v2, 1  ;;  %p1275_p7 = scmp.lt.s32.totalorder %s1273_s11, %s1267_s29 }
 0x156   : > { %v1563_v36 = vpop.permute.xlu1 %443  ;;  %v596_v15 = vrot.slane %v1571_v2, 2 }
 0x157   : > { %v401_v45 = vmul.f32 %v399_v25, %v1577_v41  ;;  %v407_v47 = vmul.f32 %v405_v27, %v1577_v41  ;;  %v517_v50 = vrot.slane %v515_v44, 3  ;;  %v413_v62 = vmul.f32 %v411_v54, %v1597_v53  ;;  %p1276_p8 = por %p1275_p7, %p1274_p6 }
 0x158   : > { %v595_v14 = vmul.f32 %v593_v3, %v1571_v2 }
 0x159   : > { %v833_v51 = vrot.slane %v401_v45, %v1586_v46  ;;  %v842_v52 = vrot.slane %v407_v47, %v1590_v34  ;;  %v519_v56 = vsub.f32 %v1571_v2, %v517_v50  ;;  %v536_v58 = vadd.f32 %v517_v50, %v1571_v2  ;;  %p1277_p10 = pnand %p1276_p8, %p1270_p5 }
 0x15a   : > { %v869_v13 = vrot.slane %v413_v62, %v1602_v61  ;;  %v304_v45 = vrot.slane %v303_v23, 2 }
 0x15b   : > { %v1569_v38 = vpop.permute.xlu1 %464  ;;  %v838_v59 = vsub.f32 %v833_v51, %v836_v28  ;;  %v847_v60 = vsub.f32 %v842_v52, %v845_v39  ;;  %v529_v63 = vrot.slane %v519_v56, %v1586_v46  ;;  %v541_v0 = vrot.slane %v536_v58, %v1586_v46 }
 0x15c   : > { %v553_v9 = vrot.slane %v519_v56, %v1590_v34  ;;  %v562_v11 = vrot.slane %v536_v58, %v1590_v34  ;;  %v573_v24 = vrot.slane %v519_v56, %v1602_v61  ;;  %v582_v25 = vrot.slane %v536_v58, %v1602_v61 }
 0x15d   : > { %v853_v4 = vmul.f32 %v851_v30, %v838_v59  ;;  %v861_v5 = vmul.f32 %v857_v33, %v838_v59  ;;  %v859_v6 = vmul.f32 %v857_v33, %v847_v60  ;;  %v862_v7 = vmul.f32 %v851_v30, %v847_v60 }
 0x15e   : > { %v874_v26 = vsub.f32 %v869_v13, %v872_v35  ;;  %v598_v33 = vmul.f32 %v596_v15, %v595_v14  ;;  %v440_v52 = vrot.slane %v1577_v41, %v1586_v46  ;;  %v451_v35 = vrot.slane %v1577_v41, %v1590_v34 }
 0x15f   : > { %v860_v16 = vsub.f32 %v853_v4, %v859_v6  ;;  %v863_v17 = vadd.f32 %v862_v7, %v861_v5  ;;  %v305_v60 = vadd.f32 %v304_v45, %v303_v23  ;;  %v462_v34 = vrot.slane %v1597_v53, %v1602_v61 }
 0x160   : > { %v1579_v42 = vpop.permute.xlu1 %878  ;;  %v875_v32 = vand.u32 2147483647, %v874_v26  ;;  %v446_v46 = vsub.f32 %v440_v52, %v1563_v36  ;;  %v484_v36 = vsub.s32 4, %v1574_v40 }
 0x161   : > { %v864_v37 = vand.u32 2147483647, %v860_v16  ;;  %v865_v39 = vand.u32 2147483647, %v863_v17  ;;  %v306_v5 = vrot.slane %v305_v60, 1  ;;  %v467_v61 = vsub.f32 %v462_v34, %v1569_v38 }
 0x162   : > { %v447_v7 = vand.u32 2147483647, %v446_v46  ;;  %v485_v15 = vrot.slane %v1577_v41, %v484_v36 }
 0x163   : > { %vm881_vm3 = vcmp.le.f32.partialorder %v864_v37, %v1579_v42  ;;  %vm886_vm4 = vcmp.le.f32.partialorder %v865_v39, %v884_v49  ;;  %v456_v42 = vsub.f32 %v451_v35, %v1581_v43  ;;  %v307_v12 = vadd.f32 %v306_v5, %v305_v60 }
 0x164   : > { %v1592_v48 = vpop.permute.xlu1 %897  ;;  %vm887_vm6 = vmand %vm881_vm3, %vm886_vm4  ;;  %v468_v13 = vand.u32 2147483647, %v467_v61  ;;  %v1376_v60 = vmov 10000.0  }
 0x165   : > { %v457_v43 = vand.u32 2147483647, %v456_v42  ;;  %vm900_vm10 = vcmp.le.f32.partialorder %v864_v37, %v1592_v48  ;;  %v495_v48 = vsub.s32 5, %v1574_v40 }
 0x167   : > { %v458_v14 = vadd.f32 %v457_v43, %v447_v7 }
 0x183   : > { %v1561_v29 = vpop.f32.mrb[0].mxu0 }
 0x184   : > { %v1127_v31 = vpop.f32.mrb[1].mxu0  ;;  %v392_v45 = vsub.f32 0.0, %v1561_v29 }
 0x185   : > { %v472_v31 = vsub.s32 3, %v1574_v40 }
 0x187   : > { %v611_v54 = vrot.slane %v598_v33, %v472_v31 }
 0x1ac   : > { %v533_v55 = vpop.permute.xlu1 %532  ;;  %v545_v57 = vpop.permute.xlu0 %544 }
 0x1ad   : > { %v535_v18 = vmax.f32 %v529_v63, %v533_v55  ;;  %v547_v19 = vmin.f32 %v541_v0, %v545_v57  ;;  %v917_v57 = vstv %s1615_s13 }
 0x1ae   : > { %vm1636_vm7 = vcmp.lt.s32.totalorder %v1574_v40, %v917_v57  ;;  %v1375_v57 = vmov 100.0  }
 0x1af   : > { %v548_v27 = vsub.f32 %v547_v19, %v535_v18 }
 0x1b1   : > { %v556_v8 = vpop.permute.xlu1 %555  ;;  %v576_v10 = vpop.permute.xlu0 %575  ;;  %v549_v55 = vmax.f32 %v548_v27, 0.0 }
 0x1b2   : > { %v558_v21 = vmax.f32 %v553_v9, %v556_v8  ;;  %v578_v47 = vmax.f32 %v573_v24, %v576_v10 }
 0x1b5   : > { %v565_v20 = vpop.permute.xlu1 %564 }
 0x1b6   : > { %v567_v22 = vmin.f32 %v562_v11, %v565_v20  ;;  %v890_v30 = vpop.permute.xlu0 %889  ;;  %v473_v11 = vrot.slane %v1577_v41, %v472_v31  ;;  %v469_v41 = vadd.f32 %v468_v13, %v458_v14 }
 0x1b7   : > { %vm1627_vm5 = vcmp.lt.f32.partialorder %v875_v32, %v890_v30 }
 0x1b8   : > { %v568_v28 = vsub.f32 %v567_v22, %v558_v21  ;;  %vm893_vm8 = vmand %vm887_vm6, %vm1627_vm5  ;;  %v496_v21 = vrot.slane %v1597_v53, %v495_v48  ;;  %v506_v22 = vsub.s32 6, %v1574_v40 }
 0x1b9   : > { %vm1647_vm11 = vmand %vm893_vm8, %vm1636_vm7 }
 0x1ba   : > { %v585_v44 = vpop.permute.xlu1 %584  ;;  %v569_v50 = vmax.f32 %v568_v28, 0.0  ;;  %v507_v37 = vrot.slane %v1571_v2, %v506_v22 }
 0x1bb   : > { %v587_v51 = vmin.f32 %v582_v25, %v585_v44  ;;  %v615_v59 = vpop.permute.xlu0 %614 }
 0x1bc   : > { %v590_v62 = vmul.f32 %v569_v50, %v549_v55  ;;  %v617_v4 = vadd.f32 %v615_v59, %v611_v54 }
 0x1bd   : > { %v588_v56 = vsub.f32 %v587_v51, %v578_v47 }
 0x1bf   : > { %v589_v63 = vmax.f32 %v588_v56, 0.0  ;;  %v903_v0 = vpop.permute.xlu1 %902 }
 0x1c0   : > { %vm905_vm9 = vcmp.le.f32.partialorder %v865_v39, %v903_v0  ;;  %v488_v16 = vpop.permute.xlu0 %487 }
 0x1c1   : > { %v591_v3 = vmul.f32 %v590_v62, %v589_v63  ;;  %vm906_vm12 = vmand %vm900_vm10, %vm905_vm9  ;;  %v490_v23 = vsub.f32 %v485_v15, %v488_v16 }
 0x1c3   : > { %v618_v6 = vsub.f32 %v617_v4, %v591_v3  ;;  %v491_v33 = vand.u32 2147483647, %v490_v23 }
 0x1c4   : > { %v911_v9 = vpop.permute.xlu1 %910 }
 0x1c5   : > { %v619_v10 = vmax.f32 %v618_v6, 1e-06  ;;  %vm913_vm13 = vcmp.lt.f32.partialorder %v875_v32, %v911_v9 }
 0x1c6   : > { %vm914_vm14 = vmand %vm906_vm12, %vm913_vm13 }
 0x1c7   : > { %1251 = vrcp.f32 %v619_v10  ;;  %vm1654_vm15 = vmand %vm914_vm14, %vm1636_vm7 }
 0x1c8   : > { %vm923_vm0 = vmor %vm1647_vm11, %vm1654_vm15  ;;  %1253 = vrcp.f32 %v307_v12 }
 0x1c9   : > { %v924_v17 = vsel %vm923_vm0, 1.0, %v1351_v1  ;;  %v477_v18 = vpop.permute.xlu1 %476  ;;  %vm932_vm1 = vmand %vm1647_vm11, %vm1654_vm15 }
 0x1ca   : > { %v925_v19 = vrot.slane %v924_v17, 4  ;;  %v479_v20 = vsub.f32 %v473_v11, %v477_v18  ;;  %v935_v58 = vsel %vm932_vm1, 0.0, %v1375_v57 }
 0x1cc   : > { %v926_v24 = vmax.f32 %v924_v17, %v925_v19  ;;  %v480_v25 = vand.u32 2147483647, %v479_v20 }
 0x1ce   : > { %v927_v26 = vrot.slane %v926_v24, 2  ;;  %v481_v28 = vadd.f32 %v480_v25, %v469_v41  ;;  %v499_v30 = vpop.permute.xlu1 %498 }
 0x1cf   : > { %v501_v31 = vsub.f32 %v496_v21, %v499_v30 }
 0x1d0   : > { %v928_v1 = vmax.f32 %v926_v24, %v927_v26  ;;  %v492_v40 = vadd.f32 %v491_v33, %v481_v28 }
 0x1d1   : > { %v1252_v39 = vpop.eup %1251  ;;  %v502_v27 = vand.u32 2147483647, %v501_v31 }
 0x1d2   : > { %v621_v53 = vmul.f32 %v1252_v39, %v591_v3  ;;  %v929_v50 = vrot.slane %v928_v1, 1  ;;  %v1254_v32 = vpop.eup %1253 }
 0x1d3   : > { %v510_v44 = vpop.permute.xlu1 %509  ;;  %v503_v2 = vadd.f32 %v502_v27, %v492_v40  ;;  %v393_v35 = vmul.f32 %v1254_v32, %v392_v45 }
 0x1d4   : > { %v941_v47 = vsel %vm1636_vm7, %v621_v53, 0.0  ;;  %v512_v51 = vsub.f32 %v507_v37, %v510_v44  ;;  %v930_v55 = vmax.f32 %v928_v1, %v929_v50 }
 0x1d5   : > { %942 = vst [vmem:[%s288_s16] sm:$0xff] %v941_v47 }
 0x1d6   : > { %v513_v52 = vand.u32 2147483647, %v512_v51  ;;  %vm931_vm2 = vcmp.gt.f32.partialorder %v930_v55, 0.0 }
 0x1d7   : > { %v937_v62 = vsel %vm931_vm2, 0.0, %v1376_v60 }
 0x1d8   : > { %v514_v54 = vadd.f32 %v513_v52, %v503_v2 }
 0x1da   : > { %v933_v29 = vadd.f32 %v514_v54, %v393_v35 }
 0x1dc   : > { %v934_v56 = vsub.f32 %v933_v29, %v621_v53 }
 0x1de   : > { %v936_v59 = vadd.f32 %v935_v58, %v934_v56 }
 0x1e0   : > { %v938_v63 = vadd.f32 %v937_v62, %v936_v59 }
 0x1e2   : > { %v939_v0 = vsel %vm1636_vm7, %v938_v63, 1e+08 }
 0x1e3   : > { %940 = vst [vmem:[%s254_s19] sm:$0xff] %v939_v0 }
 0x1e4   : > { %1280 = shalt.err (!%p1277_p10)
}
 0x1e5   : > { %s1281_s13 = scalar_lea.hbm %s1684_s28, 128  ;;  %s1285_s16 = scalar_lea.hbm %s1737_s4, 256 }
 0x1e6   : > { %p1282_p11 = scmp.ne.s32.totalorder %s1684_s28, %s1281_s13  ;;  %p1286_p1 = scmp.lt.u32.totalorder %s1684_s28, %s1737_s4 }
 0x1e7   : > { %p1287_p2 = scmp.lt.u32.totalorder %s1285_s16, %s1281_s13  ;;  %p1289_p4 = scmp.lt.u32.totalorder %s1281_s13, %s1684_s28 }
 0x1e8   : > { %p1283_p12 = pnand %p1282_p11, %p1451_p9 }
 0x1e9   : > { %p1288_p3 = por %p1287_p2, %p1286_p1 }
 0x1ea   : > { %p1284_p0 = pneg %p1283_p12 }
 0x1eb   : > { %p1290_p5 = por %p1289_p4, %p1288_p3 }
 0x1ed   : > { %p1291_p6 = pnand %p1290_p5, %p1284_p0 }
 0x1ef   : > { %1294 = shalt.err (!%p1291_p6)
}
 0x1f0   : > { %1134 = dma.vmem_to_hbm [thread:$0]  (%p1451_p9), %s1686_s20, 128, %s1684_s28, %s944_s25  }
 0x1f1 PF: > { %p1140_p7 = scmp.ge.s32.totalorder %s1347_s27, 2  ;;  %s980_s18 = sand.u32 1, %s1327_s23  }
 0x1f2   : > { %s981_s19 = scalar_lea.sflag [#allocation5], %s980_s18 }
 0x1f3   : > { %p1137_p8 = pnand %p1140_p7, %p1458_p13 }
 0x1f5   : > { %1322 = dma.done.wait (!%p1137_p8), %s981_s19, 128  }
 0x1f6   : > { %1324 = vsyncadd (!%p1137_p8), %s981_s19, 4294967168  ;;  %s25_s27 = sadd.s32 1, %s1347_s27   ;;  %s1751_s23 = smov %s1331_s24 }
 0x1f7   : > { %p22_p10 = scmp.ge.s32.totalorder %s25_s27, 4   ;;  %s1752_s24 = smov %s1335_s0 }
 0x1f8   : > { %s1753_s0 = smov %s1464_s10  ;;  %s1754_s25 = smov %s1343_s26 }
 0x1f9   : > { %s1755_s26 = smov %s1757_s30  ;;  %24 = sbr.rel (!%p22_p10) target bundleno = 19 (0x13), region = 85 }
 0x200   :  { %996 = vsyncpa [#allocation5], 1 }
 0x201   :  { %998 = vsyncpa [#allocation5 + $0x1], 1 }

</bundles_post_ra>
